<compile_context>
chip_gen: v6e
topology: v6e:2x2x1
jax: 0.10.0
libtpu: 0.0.40
codegen_flags: <defaults>
</compile_context>

<pallas_src>
import math
from functools import partial

import jax
import jax.numpy as jnp
from jax import lax
from jax.experimental import pallas as pl
from jax.experimental.pallas import tpu as pltpu

# f32 eps, matching torch.finfo(torch.float32).eps used by F.rms_norm(eps=None)
_RMS_EPS = 1.1920928955078125e-07
_LOG2E = 1.4426950408889634


def _vmem_limit_bytes():
    """Per-generation scoped-VMEM budget (~3/4 of physical VMEM)."""
    cap = None
    try:
        cap = pltpu.get_tpu_info().vmem_capacity_bytes
    except Exception:
        cap = None
    if not cap:
        kind = ""
        try:
            kind = jax.devices()[0].device_kind.lower()
        except Exception:
            pass
        cap = (64 << 20) if "v7" in kind else (128 << 20)  # v7x: 64 MiB, v5e/v6e: 128
    return int(cap * 3 // 4)


def _heads_per_group(head_dim, num_heads):
    """Smallest head group G so the kernel-2 lane block G*Dh is (8,128)-legal."""
    if head_dim % 128 == 0:
        return 1
    g = 128 // math.gcd(128, head_dim)          # smallest g with g*Dh % 128 == 0
    if g <= num_heads and num_heads % g == 0:
        return g
    return num_heads                            # block covers full D (always legal)


# ---------------------------------------------------------------------------
# Kernel 1: fused QKV projection + per-head RMS norm (+ scale*log2e folded in q)
# ---------------------------------------------------------------------------
def _qkv_kernel(x_ref, wqkv_ref, pool_ref, bcast_ref, q_ref, k_ref, v_ref, *,
                dim, q_scale):
    """Grid = (B, T//tr).

    x_ref     : (1, tr, D)  bf16 activations (cast in the wrapper)
    wqkv_ref  : (D, 3D)     bf16, pre-transposed [Wq; Wk; Wv].T (constant index_map)
    pool_ref  : (D, H) f32  block-diagonal 1/Dh  (per-head mean-square pooling)
    bcast_ref : (H, D) f32  block-diagonal 1.0   (per-head broadcast back to D)
    q/k/v_ref : (1, tr, D)  bf16 outputs
    """
    x = x_ref[0]                                                          # (tr, D)
    qkv = jnp.dot(x, wqkv_ref[...], preferred_element_type=jnp.float32)   # (tr, 3D)

    q = qkv[:, :dim]
    k = qkv[:, dim:2 * dim]
    v = qkv[:, 2 * dim:]

    pool = pool_ref[...]
    bcast = bcast_ref[...]

    def head_rms(a):
        # per-head mean-of-squares via a tiny pooling matmul; stats stay in f32.
        ms = jnp.dot(a * a, pool, preferred_element_type=jnp.float32)     # (tr, H)
        inv = lax.rsqrt(ms + _RMS_EPS)                                    # (tr, H)
        return a * jnp.dot(inv, bcast, preferred_element_type=jnp.float32)

    q_ref[0] = (head_rms(q) * q_scale).astype(q_ref.dtype)   # log2e/sqrt(Dh) folded in
    k_ref[0] = head_rms(k).astype(k_ref.dtype)
    v_ref[0] = v.astype(v_ref.dtype)


# ---------------------------------------------------------------------------
# Kernel 2: flash attention (online softmax, exp2) + fused output projection
# ---------------------------------------------------------------------------
def _attn_kernel(q_ref, k_ref, v_ref, wo_ref, o_ref,
                 m_ref, l_ref, acc_ref, oacc_ref, *, group, head_dim):
    """Grid = (B, T//tq, n_groups, T//tk); ki innermost (reduction) axis.

    q_ref  : (1, tq, G*Dh) bf16  (rms-normed, pre-scaled by log2e/sqrt(Dh))
    k_ref  : (1, tk, G*Dh) bf16
    v_ref  : (1, tk, G*Dh) bf16
    wo_ref : (n_groups, G*Dh, D) bf16, fully resident (constant index_map)
    o_ref  : (1, tq, D)          lane-dense output block
    scratch: m (tq,G) f32, l (tq,G) f32, acc (tq,G*Dh) f32, oacc (tq,D) f32
    """
    hg = pl.program_id(2)
    ki = pl.program_id(3)
    ng = pl.num_programs(2)
    nk = pl.num_programs(3)

    @pl.when(jnp.logical_and(hg == 0, ki == 0))
    def _():
        oacc_ref[...] = jnp.zeros_like(oacc_ref)

    @pl.when(ki == 0)
    def _():
        m_ref[...] = jnp.full_like(m_ref, -jnp.inf)
        l_ref[...] = jnp.zeros_like(l_ref)
        acc_ref[...] = jnp.zeros_like(acc_ref)

    q = q_ref[0]   # (tq, G*Dh)
    k = k_ref[0]   # (tk, G*Dh)
    v = v_ref[0]   # (tk, G*Dh)

    # Static per-head loop inside the group (G is 1 or 2 for realistic Dh).
    for g in range(group):
        cs = slice(g * head_dim, (g + 1) * head_dim)
        # scores: contract head dims directly (no in-kernel transpose of k).
        s = lax.dot_general(q[:, cs], k[:, cs], (((1,), (1,)), ((), ())),
                            preferred_element_type=jnp.float32)          # (tq, tk)
        m_prev = m_ref[:, g:g + 1]
        m_new = jnp.maximum(m_prev, jnp.max(s, axis=-1, keepdims=True))
        alpha = jnp.exp2(m_prev - m_new)            # log2e already folded into q
        p = jnp.exp2(s - m_new)
        l_ref[:, g:g + 1] = alpha * l_ref[:, g:g + 1] + jnp.sum(p, axis=-1,
                                                                keepdims=True)
        acc_ref[:, cs] = alpha * acc_ref[:, cs] + jnp.dot(
            p.astype(jnp.bfloat16), v[:, cs], preferred_element_type=jnp.float32)
        m_ref[:, g:g + 1] = m_new

    @pl.when(ki == nk - 1)
    def _():
        # normalize each head of the group, then fold its output projection
        for g in range(group):
            cs = slice(g * head_dim, (g + 1) * head_dim)
            inv = pl.reciprocal(l_ref[:, g:g + 1], approx=True)
            acc_ref[:, cs] = acc_ref[:, cs] * inv
        oacc_ref[...] += jnp.dot(acc_ref[...].astype(jnp.bfloat16), wo_ref[hg],
                                 preferred_element_type=jnp.float32)     # (tq, D)

    @pl.when(jnp.logical_and(hg == ng - 1, ki == nk - 1))
    def _():
        o_ref[0] = oacc_ref[...].astype(o_ref.dtype)


# ---------------------------------------------------------------------------
# Wrapper
# ---------------------------------------------------------------------------
def flex_mha_pallas(x, wq, wk, wv, wo, *, num_heads,
                    row_tile=512, q_tile=512, kv_tile=1024, out_dtype=None):
    B, T, D = x.shape
    assert D % num_heads == 0, "dim must be divisible by num_heads"
    Dh = D // num_heads
    out_dtype = x.dtype if out_dtype is None else out_dtype
    vmem_limit = _vmem_limit_bytes()

    tr = min(row_tile, T)
    tq = min(q_tile, T)
    tk = min(kv_tile, T)
    # keep >=2 parallel (b, qi) steps so megacore / v7x's 2 TCs can both work
    if B * (T // tq) < 2 and tq % 16 == 0 and T % (tq // 2) == 0:
        tq //= 2
    assert T % tr == 0 and T % tq == 0 and T % tk == 0, "T must divide tile sizes"

    G = _heads_per_group(Dh, num_heads)   # heads per kernel-2 grid step
    GDh = G * Dh
    n_groups = num_heads // G

    # attention scale; log2(e) folded in so kernel 2 can use exp2 on the EUP
    q_scale = _LOG2E / math.sqrt(Dh)

    # one-time weight prep in XLA: fused + pre-transposed, bf16 for the MXU
    wqkv_t = jnp.concatenate([wq, wk, wv], axis=0).T.astype(jnp.bfloat16)   # (D, 3D)
    wo_groups = wo.T.reshape(n_groups, GDh, D).astype(jnp.bfloat16)

    head_id = jnp.arange(D, dtype=jnp.int32) // Dh
    onehot = head_id[:, None] == jnp.arange(num_heads, dtype=jnp.int32)[None, :]
    pool = onehot.astype(jnp.float32) / float(Dh)                           # (D, H)
    bcast = onehot.T.astype(jnp.float32)                                    # (H, D)

    x_bf = x.astype(jnp.bfloat16)   # cast once in the wrapper: halves x DMA bytes

    # ---- kernel 1: QKV projection + per-head RMS norm ----
    act_spec = pl.BlockSpec((1, tr, D), lambda b, i: (b, i, 0))
    q, k, v = pl.pallas_call(
        partial(_qkv_kernel, dim=D, q_scale=q_scale),
        out_shape=tuple(jax.ShapeDtypeStruct((B, T, D), jnp.bfloat16)
                        for _ in range(3)),
        grid_spec=pltpu.PrefetchScalarGridSpec(
            num_scalar_prefetch=0,
            grid=(B, T // tr),
            in_specs=[
                act_spec,
                pl.BlockSpec((D, 3 * D), lambda b, i: (0, 0)),
                pl.BlockSpec((D, num_heads), lambda b, i: (0, 0)),
                pl.BlockSpec((num_heads, D), lambda b, i: (0, 0)),
            ],
            out_specs=(act_spec, act_spec, act_spec),
        ),
        compiler_params=pltpu.CompilerParams(
            dimension_semantics=("parallel", "parallel"),
            vmem_limit_bytes=vmem_limit),
    )(x_bf, wqkv_t, pool, bcast)

    # ---- kernel 2: flash attention + fused output projection ----
    # q/k/v are read straight from their (B, T, D) layout: the head-group axis hg
    # selects a G*Dh-wide lane slice (no wrapper-side transpose / HBM round-trip).
    out = pl.pallas_call(
        partial(_attn_kernel, group=G, head_dim=Dh),
        out_shape=jax.ShapeDtypeStruct((B, T, D), out_dtype),
        grid_spec=pltpu.PrefetchScalarGridSpec(
            num_scalar_prefetch=0,
            grid=(B, T // tq, n_groups, T // tk),
            in_specs=[
                pl.BlockSpec((1, tq, GDh), lambda b, qi, hg, ki: (b, qi, hg)),
                pl.BlockSpec((1, tk, GDh), lambda b, qi, hg, ki: (b, ki, hg)),
                pl.BlockSpec((1, tk, GDh), lambda b, qi, hg, ki: (b, ki, hg)),
                # Wo fully resident: constant index_map -> single DMA for the whole run
                pl.BlockSpec((n_groups, GDh, D), lambda b, qi, hg, ki: (0, 0, 0)),
            ],
            out_specs=pl.BlockSpec((1, tq, D), lambda b, qi, hg, ki: (b, qi, 0)),
            scratch_shapes=[
                pltpu.VMEM((tq, G), jnp.float32),      # m (running max, per head)
                pltpu.VMEM((tq, G), jnp.float32),      # l (running denom, per head)
                pltpu.VMEM((tq, GDh), jnp.float32),    # per-group attention acc
                pltpu.VMEM((tq, D), jnp.float32),      # output-projection acc
            ],
        ),
        compiler_params=pltpu.CompilerParams(
            # NOTE: the head-group and kv axes MUST remain "arbitrary" (sequential):
            # oacc accumulates across head groups and m/l/acc across kv tiles.
            # Marking them "parallel" would silently break the accumulation.
            dimension_semantics=("parallel", "parallel", "arbitrary", "arbitrary"),
            vmem_limit_bytes=vmem_limit),
    )(q, k, v, wo_groups)
    return out


# ---------------------------------------------------------------------------
# Pure-JAX reference mirroring the PyTorch forward (eval mode, f32)
# ---------------------------------------------------------------------------
def flex_mha_reference(x, wq, wk, wv, wo, *, num_heads):
    B, T, D = x.shape
    head_dim = D // num_heads
    q = (x @ wq.T).reshape(B, T, num_heads, head_dim)
    k = (x @ wk.T).reshape(B, T, num_heads, head_dim)
    v = (x @ wv.T).reshape(B, T, num_heads, head_dim)

    def rms(a):
        return a * lax.rsqrt(jnp.mean(a * a, axis=-1, keepdims=True) + _RMS_EPS)

    q, k = rms(q), rms(k)
    q, k, v = (t.transpose(0, 2, 1, 3) for t in (q, k, v))     # (B, H, T, Dh)
    s = jnp.einsum("bhtd,bhsd->bhts", q, k) / math.sqrt(head_dim)
    p = jax.nn.softmax(s, axis=-1)
    y = jnp.einsum("bhts,bhsd->bhtd", p, v)
    y = y.transpose(0, 2, 1, 3).reshape(B, T, D)
    return y @ wo.T


if __name__ == "__main__":
    def run_case(B, T, DIM, NUM_HEADS, seed, atol):
        key = jax.random.PRNGKey(seed)
        kx, kq, kk, kv, ko = jax.random.split(key, 5)
        # nn.Linear default init: U(-1/sqrt(in_features), 1/sqrt(in_features)), no bias
        bound = 1.0 / math.sqrt(DIM)
        wq = jax.random.uniform(kq, (DIM, DIM), jnp.float32, -bound, bound)
        wk = jax.random.uniform(kk, (DIM, DIM), jnp.float32, -bound, bound)
        wv = jax.random.uniform(kv, (DIM, DIM), jnp.float32, -bound, bound)
        wo = jax.random.uniform(ko, (DIM, DIM), jnp.float32, -bound, bound)
        x = jax.random.normal(kx, (B, T, DIM), jnp.float32)

        out = flex_mha_pallas(x, wq, wk, wv, wo, num_heads=NUM_HEADS)
        out = jax.block_until_ready(out)
        assert out.shape == (B, T, DIM)

        ref = flex_mha_reference(x, wq, wk, wv, wo, num_heads=NUM_HEADS)
        # bf16 MXU inputs (f32 accumulation) + approx reciprocal -> relaxed tolerance
        max_err = float(jnp.max(jnp.abs(out - ref)))
        assert jnp.allclose(out, ref, atol=atol, rtol=atol), (B, T, DIM, max_err)

    # small shapes per the spec (grouped-head path: Dh=8 -> group covers full D)
    run_case(2, 8, 32, 4, seed=0, atol=3e-2)
    # modest Dh=128 case exercising the no-transpose per-head fast path (G=1)
    run_case(2, 256, 256, 2, seed=1, atol=4e-2)

    print("KERNEL_OK")
</pallas_src>

<mosaic_0001>
module attributes {stable_mosaic.version = 11 : i64} {
  func.func @_qkv_kernel(%arg0: i32, %arg1: i32, %arg2: memref<1x8x32xbf16, #tpu.memory_space<vmem>>, %arg3: memref<32x96xbf16, #tpu.memory_space<vmem>>, %arg4: memref<32x4xf32, #tpu.memory_space<vmem>>, %arg5: memref<4x32xf32, #tpu.memory_space<vmem>>, %arg6: memref<1x8x32xbf16, #tpu.memory_space<vmem>>, %arg7: memref<1x8x32xbf16, #tpu.memory_space<vmem>>, %arg8: memref<1x8x32xbf16, #tpu.memory_space<vmem>>) attributes {dimension_semantics = [#tpu.dimension_semantics<parallel>, #tpu.dimension_semantics<parallel>], iteration_bounds = array<i64: 2, 1>, scalar_prefetch = 0 : i64, scratch_operands = 0 : i64, tpu.core_type = #tpu.core_type<tc>, window_params = [{transform_indices = @transform_0, window_bounds = array<i64: 1, 8, 32>}, {pipeline_mode = #tpu.pipeline_mode<synchronous>, transform_indices = @transform_1, window_bounds = array<i64: 32, 96>}, {pipeline_mode = #tpu.pipeline_mode<synchronous>, transform_indices = @transform_2, window_bounds = array<i64: 32, 4>}, {pipeline_mode = #tpu.pipeline_mode<synchronous>, transform_indices = @transform_3, window_bounds = array<i64: 4, 32>}, {transform_indices = @transform_4, window_bounds = array<i64: 1, 8, 32>}, {transform_indices = @transform_5, window_bounds = array<i64: 1, 8, 32>}, {transform_indices = @transform_6, window_bounds = array<i64: 1, 8, 32>}]} {
    %c0 = arith.constant 0 : index
    %c0_0 = arith.constant 0 : index
    %c0_1 = arith.constant 0 : index
    %0 = vector.load %arg2[%c0, %c0_0, %c0_1] : memref<1x8x32xbf16, #tpu.memory_space<vmem>>, vector<1x8x32xbf16>
    %1 = vector.shape_cast %0 : vector<1x8x32xbf16> to vector<8x32xbf16>
    %c0_2 = arith.constant 0 : index
    %c0_3 = arith.constant 0 : index
    %2 = vector.load %arg3[%c0_2, %c0_3] : memref<32x96xbf16, #tpu.memory_space<vmem>>, vector<32x96xbf16>
    %cst = arith.constant dense<0.000000e+00> : vector<8x96xf32>
    %3 = tpu.matmul %1, %2, %cst {dimension_numbers = #tpu.dot_dimension_numbers<[1], [0], [0], [1], [0, 0, 1, 1], [], []>} : vector<8x32xbf16>, vector<32x96xbf16>, vector<8x96xf32> -> vector<8x96xf32>
    %4 = vector.extract_strided_slice %3 {offsets = [0, 0], sizes = [8, 32], strides = [1, 1]} : vector<8x96xf32> to vector<8x32xf32>
    %5 = vector.extract_strided_slice %3 {offsets = [0, 32], sizes = [8, 32], strides = [1, 1]} : vector<8x96xf32> to vector<8x32xf32>
    %6 = vector.extract_strided_slice %3 {offsets = [0, 64], sizes = [8, 32], strides = [1, 1]} : vector<8x96xf32> to vector<8x32xf32>
    %c0_4 = arith.constant 0 : index
    %c0_5 = arith.constant 0 : index
    %7 = vector.load %arg4[%c0_4, %c0_5] : memref<32x4xf32, #tpu.memory_space<vmem>>, vector<32x4xf32>
    %c0_6 = arith.constant 0 : index
    %c0_7 = arith.constant 0 : index
    %8 = vector.load %arg5[%c0_6, %c0_7] : memref<4x32xf32, #tpu.memory_space<vmem>>, vector<4x32xf32>
    %9 = arith.mulf %4, %4 : vector<8x32xf32>
    %cst_8 = arith.constant dense<0.000000e+00> : vector<8x4xf32>
    %10 = tpu.matmul %9, %7, %cst_8 {dimension_numbers = #tpu.dot_dimension_numbers<[1], [0], [0], [1], [0, 0, 1, 1], [], []>} : vector<8x32xf32>, vector<32x4xf32>, vector<8x4xf32> -> vector<8x4xf32>
    %cst_9 = arith.constant 1.1920929E-7 : f32
    %11 = vector.broadcast %cst_9 : f32 to vector<8x4xf32>
    %12 = arith.addf %10, %11 : vector<8x4xf32>
    %13 = math.rsqrt %12 : vector<8x4xf32>
    %cst_10 = arith.constant dense<0.000000e+00> : vector<8x32xf32>
    %14 = tpu.matmul %13, %8, %cst_10 {dimension_numbers = #tpu.dot_dimension_numbers<[1], [0], [0], [1], [0, 0, 1, 1], [], []>} : vector<8x4xf32>, vector<4x32xf32>, vector<8x32xf32> -> vector<8x32xf32>
    %15 = arith.mulf %4, %14 : vector<8x32xf32>
    %cst_11 = arith.constant 0.510069728 : f32
    %16 = vector.broadcast %cst_11 : f32 to vector<8x32xf32>
    %17 = arith.mulf %15, %16 : vector<8x32xf32>
    %18 = arith.truncf %17 : vector<8x32xf32> to vector<8x32xbf16>
    %c0_12 = arith.constant 0 : index
    %c0_13 = arith.constant 0 : index
    %c0_14 = arith.constant 0 : index
    %19 = vector.load %arg6[%c0_12, %c0_13, %c0_14] : memref<1x8x32xbf16, #tpu.memory_space<vmem>>, vector<1x8x32xbf16>
    %20 = vector.shape_cast %19 : vector<1x8x32xbf16> to vector<8x32xbf16>
    %21 = vector.shape_cast %18 : vector<8x32xbf16> to vector<1x8x32xbf16>
    tpu.vector_store %arg6[%c0_12, %c0_13, %c0_14], %21 {strides = array<i32>} : memref<1x8x32xbf16, #tpu.memory_space<vmem>>, vector<1x8x32xbf16>,
    %22 = arith.mulf %5, %5 : vector<8x32xf32>
    %cst_15 = arith.constant dense<0.000000e+00> : vector<8x4xf32>
    %23 = tpu.matmul %22, %7, %cst_15 {dimension_numbers = #tpu.dot_dimension_numbers<[1], [0], [0], [1], [0, 0, 1, 1], [], []>} : vector<8x32xf32>, vector<32x4xf32>, vector<8x4xf32> -> vector<8x4xf32>
    %cst_16 = arith.constant 1.1920929E-7 : f32
    %24 = vector.broadcast %cst_16 : f32 to vector<8x4xf32>
    %25 = arith.addf %23, %24 : vector<8x4xf32>
    %26 = math.rsqrt %25 : vector<8x4xf32>
    %cst_17 = arith.constant dense<0.000000e+00> : vector<8x32xf32>
    %27 = tpu.matmul %26, %8, %cst_17 {dimension_numbers = #tpu.dot_dimension_numbers<[1], [0], [0], [1], [0, 0, 1, 1], [], []>} : vector<8x4xf32>, vector<4x32xf32>, vector<8x32xf32> -> vector<8x32xf32>
    %28 = arith.mulf %5, %27 : vector<8x32xf32>
    %29 = arith.truncf %28 : vector<8x32xf32> to vector<8x32xbf16>
    %c0_18 = arith.constant 0 : index
    %c0_19 = arith.constant 0 : index
    %c0_20 = arith.constant 0 : index
    %30 = vector.load %arg7[%c0_18, %c0_19, %c0_20] : memref<1x8x32xbf16, #tpu.memory_space<vmem>>, vector<1x8x32xbf16>
    %31 = vector.shape_cast %30 : vector<1x8x32xbf16> to vector<8x32xbf16>
    %32 = vector.shape_cast %29 : vector<8x32xbf16> to vector<1x8x32xbf16>
    tpu.vector_store %arg7[%c0_18, %c0_19, %c0_20], %32 {strides = array<i32>} : memref<1x8x32xbf16, #tpu.memory_space<vmem>>, vector<1x8x32xbf16>,
    %33 = arith.truncf %6 : vector<8x32xf32> to vector<8x32xbf16>
    %c0_21 = arith.constant 0 : index
    %c0_22 = arith.constant 0 : index
    %c0_23 = arith.constant 0 : index
    %34 = vector.load %arg8[%c0_21, %c0_22, %c0_23] : memref<1x8x32xbf16, #tpu.memory_space<vmem>>, vector<1x8x32xbf16>
    %35 = vector.shape_cast %34 : vector<1x8x32xbf16> to vector<8x32xbf16>
    %36 = vector.shape_cast %33 : vector<8x32xbf16> to vector<1x8x32xbf16>
    tpu.vector_store %arg8[%c0_21, %c0_22, %c0_23], %36 {strides = array<i32>} : memref<1x8x32xbf16, #tpu.memory_space<vmem>>, vector<1x8x32xbf16>,
    return
  }
  func.func @transform_0(%arg0: i32, %arg1: i32) -> (i32, i32, i32) {
    %c0_i32 = arith.constant 0 : i32
    %c0_i32_0 = arith.constant 0 : i32
    return %arg0, %arg1, %c0_i32 : i32, i32, i32
  }
  func.func @transform_1(%arg0: i32, %arg1: i32) -> (i32, i32) {
    %c0_i32 = arith.constant 0 : i32
    %c0_i32_0 = arith.constant 0 : i32
    %c0_i32_1 = arith.constant 0 : i32
    return %c0_i32, %c0_i32_0 : i32, i32
  }
  func.func @transform_2(%arg0: i32, %arg1: i32) -> (i32, i32) {
    %c0_i32 = arith.constant 0 : i32
    %c0_i32_0 = arith.constant 0 : i32
    %c0_i32_1 = arith.constant 0 : i32
    return %c0_i32, %c0_i32_0 : i32, i32
  }
  func.func @transform_3(%arg0: i32, %arg1: i32) -> (i32, i32) {
    %c0_i32 = arith.constant 0 : i32
    %c0_i32_0 = arith.constant 0 : i32
    %c0_i32_1 = arith.constant 0 : i32
    return %c0_i32, %c0_i32_0 : i32, i32
  }
  func.func @transform_4(%arg0: i32, %arg1: i32) -> (i32, i32, i32) {
    %c0_i32 = arith.constant 0 : i32
    %c0_i32_0 = arith.constant 0 : i32
    return %arg0, %arg1, %c0_i32 : i32, i32, i32
  }
  func.func @transform_5(%arg0: i32, %arg1: i32) -> (i32, i32, i32) {
    %c0_i32 = arith.constant 0 : i32
    %c0_i32_0 = arith.constant 0 : i32
    return %arg0, %arg1, %c0_i32 : i32, i32, i32
  }
  func.func @transform_6(%arg0: i32, %arg1: i32) -> (i32, i32, i32) {
    %c0_i32 = arith.constant 0 : i32
    %c0_i32_0 = arith.constant 0 : i32
    return %arg0, %arg1, %c0_i32 : i32, i32, i32
  }
}

</mosaic_0001>

<bundles_post_ra>
// kernel: tpu_custom_call.1
= control target key start
LH: loop header
LB: loop body
LE: loop exit
PB: predicated region body
PF: predicated region fallthrough
CT: control target
= control target key end

     0   :  { %12 = vsyncpa [#allocation3], 0  ;;  %s1433_s0 = inlined_call_operand.vmem [shape: bf16[2,8,32], index: 0, kind: input, shape index: {}]   ;;  %s1434_s1 = inlined_call_operand.vmem [shape: bf16[32,96], index: 1, kind: input, shape index: {}]   ;;  %s1435_s2 = inlined_call_operand.vmem [shape: f32[32,4], index: 2, kind: input, shape index: {}]   ;;  %s1436_s3 = inlined_call_operand.vmem [shape: f32[4,32], index: 3, kind: input, shape index: {}]   ;;  %s1437_s4 = inlined_call_operand.hbm [shape: bf16[2,8,32], index: 4, kind: output, shape index: {0}]   ;;  %s1438_s5 = inlined_call_operand.hbm [shape: bf16[2,8,32], index: 5, kind: output, shape index: {1}]   ;;  %s1439_s6 = inlined_call_operand.hbm [shape: bf16[2,8,32], index: 6, kind: output, shape index: {2}]  }
   0x1   :  { %14 = vsyncpa [#allocation3 + $0x1], 0 }
   0x2   :  { %15 = vsyncpa [#allocation5], 0 }
   0x3   :  { %17 = vsyncpa [#allocation5 + $0x1], 0  ;;  %s1215_s21 = smov 0   ;;  %s1217_s22 = smov 0  }
   0x4   :  { %s1219_s23 = smov 0   ;;  %s1221_s24 = smov 0  }
   0x5   :  { %s1223_s25 = smov 0   ;;  %s1225_s26 = smov 0  }
   0x6 LB: > { %s1441_s27 = sadd.s32 4294967295, %s1170_s26   ;;  %s1440_s28 = sadd.s32 4294967294, %s1170_s26   ;;  %s1170_s26 = sphi %s1225_s26, %s23_s26   ;;  %s1166_s25 = sphi %s1223_s25, %s1454_s25   ;;  %s1162_s24 = sphi %s1221_s24, %s1453_s24   ;;  %s1158_s23 = sphi %s1219_s23, %s1452_s23   ;;  %s1154_s22 = sphi %s1217_s22, %s1451_s22   ;;  %s1150_s21 = sphi %s1215_s21, %s1450_s21  }
   0x7   : > { %s35_s29 = sadd.s32 1, %s1166_s25  ;;  %s135_s30 = sadd.s32 1, %s1158_s23 }
   0x8   : > { %p37_p0 = scmp.ge.s32.totalorder %s35_s29, 2  ;;  %p145_p1 = scmp.ne.s32.totalorder %s1158_s23, %s1154_s22 }
   0x9   : > { %p146_p2 = scmp.eq.s32.totalorder %s1441_s27, 1  ;;  %p151_p3 = scmp.ne.s32.totalorder %s1154_s22, %s1150_s21 }
   0xa   : > { %s1456_s29 = smov (%p37_p0, %s35_s29), 0  ;;  %p152_p5 = scmp.eq.s32.totalorder %s1440_s28, 1 }
   0xb   : > { %p1257_p4 = por %p146_p2, %p145_p1  ;;  %s130_s8 = ssub.s32 %s1166_s25, %s1456_s29 }
   0xc   : > { %p879_p6 = scmp.ge.s32.totalorder %s1170_s26, 1  ;;  %p133_p7 = scmp.eq.s32.totalorder %s130_s8, 0 }
   0xd   : > { %p1266_p8 = por %p152_p5, %p151_p3  ;;  %p245_p9 = scmp.lt.s32.totalorder %s1170_s26, 3 }
   0xe   : > { %s1272_s10 = scalar_select %p133_p7, %s1158_s23, %s135_s30  }
   0xf   : > { %p246_p10 = pnand %p879_p6, %p245_p9 }
  0x10   : > { %p287_p11 = scmp.lt.s32.totalorder (!%p246_p10), %s1162_s24, 1  ;;  %s1174_s16 = smov (!%p246_p10), 96  }
  0x11   : > { %249 = sbr.rel (%p246_p10) target bundleno = 1024 (0x400), region = 36  ;;  %s1175_s8 = smov (!%p246_p10), 32  }
  0x16   : > { %v1032_v0 = vld [vmem:[%s1434_s1 + $0x8] sm:$0xff]   ;;  %v1172_v1 = vmov 0.0   ;;  %v1033_v2 = vld [vmem:[%s1434_s1] sm:$0xff]   ;;  %vm1173_vm0 = vmmov 0   ;;  %v359_v3 = vld [vmem:[%s1435_s2 + $0x18] sm:$0xff]  ;;  %s288_s19 = scalar_select %p287_p11, %s1162_s24, 1 }
  0x17   : > { %922 = vmatprep.subr.bf16.mxu0 %v1172_v1  ;;  %930 = vmatprep.subr.mxu1 %v1172_v1  ;;  %v358_v4 = vld [vmem:[%s1435_s2 + $0x10] sm:$0xff]  ;;  %vm312_vm1 = vcmask 261120   ;;  %v357_v6 = vld [vmem:[%s1435_s2 + $0x8] sm:$0xff]  ;;  %v356_v7 = vld [vmem:[%s1435_s2] sm:$0xff]  ;;  %vm440_vm2 = vcmask 1043456   ;;  %vm436_vm3 = vcmask 31744  }
  0x18   : > { %923 = vmatpush3.bf16.msra.mxu0 %v1032_v0  ;;  %926 = vmatprep.mubr.msk.bf16.mxu0 %vm1173_vm0, %v1172_v1  ;;  %s883_s20 = sshll.u32 %s288_s19, 2  ;;  %v360_v13 = vld [vmem:[%s1436_s3] sm:$0xf]  ;;  %s270_s19 = sand.u32 1, %s1154_s22   ;;  %vm517_vm4 = vcmask 257024  }
  0x19   : > { %924 = vmatprep.subr.bf16.mxu0 %v1172_v1  ;;  %931 = vmatpush3.msra.mxu1 %v359_v3  ;;  %s293_s11 = scalar_lea.vmem %s1433_s0, %s883_s20  ;;  %s1315_s20 = sshll.u32 %s270_s19, 2 }
  0x1a   : > { %932 = vmatprep.subr.mxu1 %v1172_v1  ;;  %938 = vmatprep.mubr.msk.f32.mxu1 %vm1173_vm0, %v1172_v1  ;;  %v295_v5 = vld [vmem:[%s293_s11] sm:$0xf]  ;;  %s272_s30 = scalar_lea.vmem [#allocation2], %s1315_s20  ;;  %s1320_s11 = sshll.u32 %s1162_s24, 6 }
  0x1b   : > { %933 = vmatpush3.msra.mxu1 %v358_v4  ;;  %s1326_s14 = scalar_lea.hbm %s1437_s4, %s1320_s11  ;;  %s713_s15 = sshll.u32 %s272_s30, 4  ;;  %s714_s15 = int_to_ptr.vmem [resolvable:$true] %s713_s15 }
  0x1c   : > { %925 = vmatpush3.bf16.msra.mxu0 %v1033_v2  ;;  %934 = vmatprep.subr.mxu1 %v1172_v1  ;;  %s689_s17 = scalar_lea.sflag [#allocation3], %s270_s19  ;;  %s1038_s18 = scalar_lea.vmem %s714_s15, 64 }
  0x1d   : > { %946 = vmatprep.subr.mxu0 %v1172_v1  ;;  %935 = vmatpush3.msra.mxu1 %v357_v6  ;;  %p1039_p12 = scmp.ne.s32.totalorder %s714_s15, %s1038_s18 }
  0x1e   : > { %936 = vmatprep.subr.mxu1 %v1172_v1 }
  0x1f   : > { %927 = vmatmul.mubr.msk.bf16.vlgmr.msra.gmra.mxu0 %vm312_vm1, %v295_v5  ;;  %937 = vmatpush3.msra.mxu1 %v356_v7  ;;  %p1040_p13 = pnand %p1039_p12, %p1257_p4 }
  0x20   : > { %947 = vmatpush3.msra.mxu0 %v359_v3  ;;  %954 = vmatprep.mubr.msk.f32.mxu0 %vm1173_vm0, %v1172_v1 }
  0x21   : > { %948 = vmatprep.subr.mxu0 %v1172_v1  ;;  %941 = vmatprep.subr.mxu1 %v1172_v1  ;;  %p1041_p0 = pneg %p1040_p13 }
  0x22   : > { %949 = vmatpush3.msra.mxu0 %v358_v4 }
  0x23   : > { %950 = vmatprep.subr.mxu0 %v1172_v1 }
  0x24   : > { %951 = vmatpush3.msra.mxu0 %v357_v6 }
  0x25   : > { %952 = vmatprep.subr.mxu0 %v1172_v1 }
  0x26   : > { %953 = vmatpush3.msra.mxu0 %v356_v7 }
  0xdf   : > { %v1301_v8 = vpop.f32.mrf.mxu0 }
  0xe0   : > { %v361_v9 = vmul.f32 %v1301_v8, %v1301_v8 }
  0xe1   : > { %v928_v10 = vpop.f32.mrf.mxu0 }
  0xe2   : > { %519 = vrot.lane.b32.xlu0 %v361_v9, %s1174_s16  ;;  %939 = vmatmul.mubr.msk.f32.vlgmr.msra.gmra.mxu1 %vm312_vm1, %v361_v9 }
  0xe3   : > { %v353_v11 = vpop.f32.mrf.mxu0  ;;  %943 = vmatprep.mubr.msk.f32.mxu1 %vm1173_vm0, %v1172_v1  ;;  %942 = vmatpush3.msk.msra.mxu1 %vm440_vm2, %v360_v13 }
  0xe4   : > { %957 = vmatprep.subr.mxu1 %v1172_v1 }
  0xe5   : > { %v929_v12 = vpop.f32.mrf.mxu0 }
 0x154   : > { %v520_v14 = vpop.permute.xlu0 %519 }
 0x155   : > { %955 = vmatmul.mubr.msk.f32.vlgmr.msra.gmra.mxu0 %vm312_vm1, %v520_v14 }
 0x1a2   : > { %v431_v15 = vpop.f32.mrf.mxu1 }
 0x1a3   : > { %v432_v16 = vadd.f32 1.1920929e-07, %v431_v15 }
 0x1a4   : > { %v940_v17 = vpop.f32.mrf.mxu1 }
 0x1a5   : > { %1034 = vrsqrt.f32 %v432_v16 }
 0x1b2   : > { %v1035_v18 = vpop.eup %1034 }
 0x1b3   : > { %944 = vmatmul.mubr.msk.f32.vlgmr.msra.gmra.mxu1 %vm436_vm3, %v1035_v18 }
 0x1b4   : > { %958 = vmatpush3.msk.msra.mxu1 %vm440_vm2, %v360_v13  ;;  %959 = vmatprep.mubr.msk.f32.mxu1 %vm1173_vm0, %v1172_v1 }
 0x215   : > { %v589_v19 = vpop.f32.mrf.mxu0 }
 0x216   : > { %v590_v20 = vadd.f32 1.1920929e-07, %v589_v19 }
 0x217   : > { %v956_v21 = vpop.f32.mrf.mxu0 }
 0x218   : > { %1036 = vrsqrt.f32 %v590_v20 }
 0x225   : > { %v1037_v22 = vpop.eup %1036 }
 0x226   : > { %960 = vmatmul.mubr.msk.f32.vlgmr.msra.gmra.mxu1 %vm436_vm3, %v1037_v22 }
 0x273   : > { %v510_v23 = vpop.f32.mrf.mxu1 }
 0x274   : > { %v514_v24 = vmul.f32 %v510_v23, %v1301_v8 }
 0x275   : > { %v945_v25 = vpop.f32.mrf.mxu1 }
 0x276   : > { %v515_v26 = vmul.f32 0.5100697, %v514_v24 }
 0x278   : > { %v516_v27 = vpack.c.bf16 %v515_v26, %v515_v26 }
 0x27a   : > { %518 = vst.msk [vmem:[%s272_s30] sm:$0xf] %vm517_vm4, %v516_v27 }
 0x2e6   : > { %v663_v28 = vpop.f32.mrf.mxu1 }
 0x2e7   : > { %668 = vrot.lane.b32.xlu0 %v663_v28, %s1175_s8  ;;  %s1176_s8 = smov [#allocation2]  }
 0x2e8   : > { %v961_v29 = vpop.f32.mrf.mxu1  ;;  %s1042_s24 = sshll.u32 %s1176_s8, 4  ;;  %s1043_s24 = int_to_ptr.vmem [resolvable:$false] %s1042_s24 }
 0x2e9   : > { %s1044_s28 = scalar_lea.vmem %s1043_s24, 128  ;;  %p1045_p1 = scmp.lt.s32.totalorder %s714_s15, %s1043_s24 }
 0x2ea   : > { %p1046_p2 = scmp.lt.s32.totalorder %s1044_s28, %s1038_s18 }
 0x2ec   : > { %p1047_p3 = por %p1046_p2, %p1045_p1 }
 0x2ee   : > { %p1048_p5 = pnand %p1047_p3, %p1041_p0 }
 0x359   : > { %v669_v30 = vpop.permute.xlu0 %668 }
 0x35a   : > { %v671_v31 = vmul.f32 %v669_v30, %v1301_v8 }
 0x35b   : > { %1051 = shalt.err (!%p1048_p5)
}
 0x35c   : > { %s1052_s30 = scalar_lea.hbm %s1326_s14, 64  ;;  %s1056_s13 = scalar_lea.hbm %s1437_s4, 128 }
 0x35d   : > { %p1053_p6 = scmp.ne.s32.totalorder %s1326_s14, %s1052_s30  ;;  %p1057_p10 = scmp.lt.s32.totalorder %s1326_s14, %s1437_s4 }
 0x35e   : > { %p1058_p11 = scmp.lt.s32.totalorder %s1056_s13, %s1052_s30 }
 0x35f   : > { %p1054_p7 = pnand %p1053_p6, %p1257_p4 }
 0x360   : > { %p1059_p12 = por %p1058_p11, %p1057_p10 }
 0x361   : > { %p1055_p9 = pneg %p1054_p7 }
 0x363   : > { %p1060_p13 = pnand %p1059_p12, %p1055_p9 }
 0x365   : > { %1063 = shalt.err (!%p1060_p13)
}
 0x366   : > { %962 = dma.vmem_to_hbm [thread:$0]  (%p1257_p4), %s714_s15, 64, %s1326_s14, %s689_s17   ;;  %v903_v32 = vpack.c.bf16 %v671_v31, %v671_v31  ;;  %v904_v33 = vpack.c.bf16 %v1301_v8, %v1301_v8 }
 0x367   : > { %s1177_s27 = smov 64   ;;  %s1445_s28 = sadd.s32 4294967295, %s1170_s26  }
 0x368   : > { %676 = vrot.lane.b32.xlu1 %v903_v32, %s1174_s16  ;;  %s1350_s18 = sand.u32 1, %s1445_s28   ;;  %s279_s24 = scalar_lea.vmem [#allocation4], %s1315_s20 }
 0x369   : > { %s727_s30 = sshll.u32 %s279_s24, 4  ;;  %s1357_s13 = scalar_lea.hbm %s1438_s5, %s1320_s11  ;;  %s1359_s30 = int_to_ptr.vmem [resolvable:$true] %s727_s30 }
 0x36a   : > { %s1442_s16 = scalar_lea.vmem [#allocation6], %s1315_s20  ;;  %s1064_s17 = scalar_lea.vmem %s1359_s30, 64 }
 0x36b   : > { %s741_s14 = sshll.u32 %s1442_s16, 4  ;;  %p1065_p0 = scmp.ne.s32.totalorder %s1359_s30, %s1064_s17  ;;  %s742_s14 = int_to_ptr.vmem [resolvable:$true] %s741_s14 }
 0x36c   : > { %684 = vrot.lane.b32.xlu1 %v904_v33, %s1177_s27  ;;  %s1178_s8 = smov [#allocation4]  }
 0x36d   : > { %p1066_p1 = pnand %p1065_p0, %p1257_p4  ;;  %s1068_s27 = sshll.u32 %s1178_s8, 4  ;;  %s1069_s27 = int_to_ptr.vmem [resolvable:$false] %s1068_s27 }
 0x36e   : > { %s1070_s28 = scalar_lea.vmem %s1069_s27, 128  ;;  %p1071_p3 = scmp.lt.s32.totalorder %s1359_s30, %s1069_s27 }
 0x36f   : > { %p1067_p2 = pneg %p1066_p1  ;;  %p1072_p5 = scmp.lt.s32.totalorder %s1070_s28, %s1064_s17 }
 0x371   : > { %p1073_p6 = por %p1072_p5, %p1071_p3 }
 0x373   : > { %p1074_p7 = pnand %p1073_p6, %p1067_p2 }
 0x3da   : > { %v677_v34 = vpop.permute.xlu1 %676 }
 0x3db   : > { %679 = vst.msk [vmem:[%s279_s24] sm:$0xf] %vm517_vm4, %v677_v34 }
 0x3dc   : > { %1077 = shalt.err (!%p1074_p7)
}
 0x3dd   : > { %s1078_s24 = scalar_lea.hbm %s1357_s13, 64  ;;  %s1082_s8 = scalar_lea.hbm %s1438_s5, 128 }
 0x3de   : > { %p1079_p9 = scmp.ne.s32.totalorder %s1357_s13, %s1078_s24  ;;  %p1083_p12 = scmp.lt.s32.totalorder %s1357_s13, %s1438_s5 }
 0x3df   : > { %p1084_p13 = scmp.lt.s32.totalorder %s1082_s8, %s1078_s24 }
 0x3e0   : > { %p1080_p10 = pnand %p1079_p9, %p1257_p4 }
 0x3e1   : > { %p1085_p0 = por %p1084_p13, %p1083_p12 }
 0x3e2   : > { %p1081_p11 = pneg %p1080_p10 }
 0x3e4   : > { %p1086_p1 = pnand %p1085_p0, %p1081_p11 }
 0x3e6   : > { %1089 = shalt.err (!%p1086_p1)
}
 0x3e7   : > { %s1446_s17 = scalar_lea.sflag [#allocation5], %s1350_s18  ;;  %s739_s16 = scalar_lea.hbm %s1439_s6, %s1320_s11  ;;  %v685_v35 = vpop.permute.xlu1 %684 }
 0x3e8   : > { %963 = dma.vmem_to_hbm [thread:$0]  (%p1257_p4), %s1359_s30, 64, %s1357_s13, %s1446_s17  }
 0x3e9   : > { %s1447_s15 = scalar_lea.vmem [#allocation6], %s1315_s20  ;;  %s1090_s24 = scalar_lea.vmem %s742_s14, 64 }
 0x3ea   : > { %687 = vst.msk [vmem:[%s1447_s15] sm:$0xf] %vm517_vm4, %v685_v35  ;;  %p1091_p2 = scmp.ne.s32.totalorder %s742_s14, %s1090_s24  ;;  %s1179_s19 = smov [#allocation6]  }
 0x3eb   : > { %s1094_s12 = sshll.u32 %s1179_s19, 4  ;;  %s1095_s12 = int_to_ptr.vmem [resolvable:$false] %s1094_s12 }
 0x3ec   : > { %p1092_p3 = pnand %p1091_p2, %p1257_p4  ;;  %s1096_s8 = scalar_lea.vmem %s1095_s12, 128 }
 0x3ed   : > { %p1097_p6 = scmp.lt.s32.totalorder %s742_s14, %s1095_s12  ;;  %p1098_p7 = scmp.lt.s32.totalorder %s1096_s8, %s1090_s24 }
 0x3ee   : > { %p1093_p5 = pneg %p1092_p3 }
 0x3ef   : > { %p1099_p9 = por %p1098_p7, %p1097_p6 }
 0x3f1   : > { %p1100_p10 = pnand %p1099_p9, %p1093_p5 }
 0x3f3   : > { %1103 = shalt.err (!%p1100_p10)
}
 0x3f4   : > { %s1104_s30 = scalar_lea.hbm %s739_s16, 64  ;;  %s1108_s13 = scalar_lea.hbm %s1439_s6, 128 }
 0x3f5   : > { %p1105_p11 = scmp.ne.s32.totalorder %s739_s16, %s1104_s30  ;;  %p1109_p0 = scmp.lt.s32.totalorder %s739_s16, %s1439_s6 }
 0x3f6   : > { %p1110_p1 = scmp.lt.s32.totalorder %s1108_s13, %s1104_s30 }
 0x3f7   : > { %p1106_p12 = pnand %p1105_p11, %p1257_p4 }
 0x3f8   : > { %p1111_p2 = por %p1110_p1, %p1109_p0 }
 0x3f9   : > { %p1107_p13 = pneg %p1106_p12 }
 0x3fb   : > { %p1112_p3 = pnand %p1111_p2, %p1107_p13 }
 0x3fd   : > { %1115 = shalt.err (!%p1112_p3)
}
 0x3fe   : > { %s1448_s28 = scalar_lea.sflag [#allocation5], %s1350_s18 }
 0x3ff   : > { %964 = dma.vmem_to_hbm [thread:$0]  (%p1257_p4), %s742_s14, 64, %s739_s16, %s1448_s28  }
 0x400 PF: > { %p978_p5 = scmp.ge.s32.totalorder %s1170_s26, 2  ;;  %s753_s15 = sand.u32 1, %s1150_s21  }
 0x401   : > { %s754_s24 = scalar_lea.sflag [#allocation3], %s753_s15 }
 0x402   : > { %p969_p6 = pnand %p978_p5, %p1266_p8 }
 0x404   : > { %p970_p7 = pneg %p969_p6 }
 0x406   : > { %1141 = dma.done.wait (%p970_p7), %s754_s24, 64  }
 0x407   : > { %1143 = vsyncadd (%p970_p7), %s754_s24, 4294967232  ;;  %s1449_s19 = sadd.s32 4294967294, %s1170_s26  }
 0x408   : > { %s762_s12 = sand.u32 1, %s1449_s19  }
 0x409   : > { %s763_s8 = scalar_lea.sflag [#allocation5], %s762_s12 }
 0x40a   : > { %1145 = dma.done.wait (%p970_p7), %s763_s8, 128  }
 0x40b   : > { %1147 = vsyncadd (%p970_p7), %s763_s8, 4294967168  ;;  %s23_s26 = sadd.s32 1, %s1170_s26   ;;  %s1450_s21 = smov %s1154_s22 }
 0x40c   : > { %p20_p4 = scmp.ge.s32.totalorder %s23_s26, 4   ;;  %s1451_s22 = smov %s1158_s23 }
 0x40d   : > { %s1452_s23 = smov %s1272_s10  ;;  %s1453_s24 = smov %s1166_s25 }
 0x40e   : > { %s1454_s25 = smov %s1456_s29  ;;  %22 = sbr.rel (!%p20_p4) target bundleno = 6 (0x6), region = 103 }
 0x413   :  { %777 = vsyncpa [#allocation3], 1 }
 0x414   :  { %779 = vsyncpa [#allocation3 + $0x1], 1 }
 0x415   :  { %780 = vsyncpa [#allocation5], 1 }
 0x416   :  { %782 = vsyncpa [#allocation5 + $0x1], 1 }

</bundles_post_ra>
